<compile_context>
chip_gen: v6e
topology: v6e:2x2x1
jax: 0.10.0
libtpu: 0.0.40
codegen_flags: <defaults>
</compile_context>

<pallas_src>
import functools

import jax
import jax.numpy as jnp
from jax.experimental import pallas as pl
from jax.experimental.pallas import tpu as pltpu

H_PAD = 128   # hidden_dim (64) zero-padded to lane width
A_PAD = 128   # action lanes used for the in-register fc2 result / argmax


def _round_up(n, m):
    return ((n + m - 1) // m) * m


def qnet_kernel(x_ref, w1_ref, b1_ref, w2_ref, b2_ref, q_ref, act_ref, *, num_actions):
    # fc1: (TB, D) f32 -> bf16 on the fly, contracted over exactly K=D (=27)
    # on the MXU with f32 accumulation (no garbage-lane * zero-row tricks).
    x = x_ref[...].astype(jnp.bfloat16)
    h = jnp.dot(x, w1_ref[...], preferred_element_type=jnp.float32)
    h = jnp.maximum(h + b1_ref[...], 0.0)            # bias + ReLU in f32 (VPU, v5e-safe)

    # fc2: (TB, Hp) @ (Hp, Ap) bf16 operands, f32 accumulation, 128-lane result.
    q = jnp.dot(h.astype(jnp.bfloat16), w2_ref[...], preferred_element_type=jnp.float32)
    q = q + b2_ref[...]

    # Round to the output dtype first so the fused argmax is taken over exactly
    # the values the caller sees; store only the narrow real-action slab.
    q_out = q.astype(q_ref.dtype)                    # bf16
    q_ref[...] = q_out[:, : q_ref.shape[1]]

    # Fused greedy-action epilogue: argmax over real action lanes only
    # (padded lanes -> -inf), first-occurrence tie-break like jnp.argmax.
    qv = q_out.astype(jnp.float32)                   # f32 compare path (v5e-safe)
    lane = jax.lax.broadcasted_iota(jnp.int32, qv.shape, 1)
    masked = jnp.where(lane < num_actions, qv, -jnp.inf)
    row_max = jnp.max(masked, axis=1, keepdims=True)
    idx = jnp.where(masked == row_max, lane, qv.shape[1])
    # TODO(synk): if a bundle dump ever shows the store slot binding (v5e), emit
    # act as a lane-dense 1-D (B_pad,) output instead of (B_pad, 1).
    act_ref[...] = jnp.min(idx, axis=1, keepdims=True).astype(jnp.int32)


def _choose_batch_tile(B, max_tb=1024):
    """Small batches: one grid step, rounded up to a sublane multiple.
    B >= 64: an even number (>= 2) of grid steps so both v7x TensorCores get
    work, with tiles capped at max_tb rows (big tiles amortize per-step cost)."""
    if B < 64:
        return max(8, _round_up(B, 8))
    steps = 2 * pl.cdiv(B, 2 * max_tb)               # always even, >= 2
    return _round_up(pl.cdiv(B, steps), 8)


def qnet_forward(x, w1p, b1p, w2p, b2p, *, num_actions=6, max_block_b=1024):
    """x: (B, input_dim) float32. Returns (q (B, num_actions) f32, act (B,) int32)."""
    B, D = x.shape
    assert w1p.shape[0] == D
    H_pad = w1p.shape[1]
    A_pad = w2p.shape[1]
    a_out = min(A_pad, max(8, _round_up(num_actions, 8)))   # narrow q writeback width

    TB = _choose_batch_tile(B, max_block_b)
    B_pad = pl.cdiv(B, TB) * TB
    # Only pad the batch when it doesn't divide the tile (typical DQN batches do).
    x_in = x if B_pad == B else jnp.pad(x, ((0, B_pad - B), (0, 0)))

    kernel = functools.partial(qnet_kernel, num_actions=num_actions)
    q_pad, act_pad = pl.pallas_call(
        kernel,
        out_shape=(
            jax.ShapeDtypeStruct((B_pad, a_out), jnp.bfloat16),
            jax.ShapeDtypeStruct((B_pad, 1), jnp.int32),
        ),
        grid=(B_pad // TB,),
        in_specs=[
            pl.BlockSpec((TB, D), lambda i: (i, 0)),         # x: unpadded f32, batch-tiled
            pl.BlockSpec((D, H_pad), lambda i: (0, 0)),      # w1: VMEM-resident bf16
            pl.BlockSpec((1, H_pad), lambda i: (0, 0)),      # b1: f32
            pl.BlockSpec((H_pad, A_pad), lambda i: (0, 0)),  # w2: VMEM-resident bf16
            pl.BlockSpec((1, A_pad), lambda i: (0, 0)),      # b2: f32
        ],
        out_specs=(
            pl.BlockSpec((TB, a_out), lambda i: (i, 0)),     # narrow bf16 q slab
            pl.BlockSpec((TB, 1), lambda i: (i, 0)),         # greedy action
        ),
        compiler_params=pltpu.CompilerParams(
            dimension_semantics=("parallel",),               # batch shards across TCs on v7x
        ),
    )(x_in, w1p, b1p, w2p, b2p)

    q = q_pad[:B, :num_actions].astype(jnp.float32)
    return q, act_pad[:B, 0]


def init_qnet_params(key, input_dim=27, hidden_dim=64, num_actions=6):
    """nn.Linear-style init (U(-1/sqrt(fan_in), +1/sqrt(fan_in))), stored kernel-ready.

    Weights are stored (in, out) so the kernel computes x @ W (== PyTorch
    x @ W.T + b).  w1 keeps its real input dim (27) so the kernel contracts
    over exactly K=27; hidden/action dims are zero-padded to 128 lanes.
    Matmul operands are bf16 (full MXU rate, half the DMA bytes); biases f32.
    """
    k1, k2, k3, k4 = jax.random.split(key, 4)
    bound1 = 1.0 / jnp.sqrt(jnp.float32(input_dim))
    bound2 = 1.0 / jnp.sqrt(jnp.float32(hidden_dim))
    w1 = jax.random.uniform(k1, (input_dim, hidden_dim), jnp.float32, -bound1, bound1)
    b1 = jax.random.uniform(k2, (hidden_dim,), jnp.float32, -bound1, bound1)
    w2 = jax.random.uniform(k3, (hidden_dim, num_actions), jnp.float32, -bound2, bound2)
    b2 = jax.random.uniform(k4, (num_actions,), jnp.float32, -bound2, bound2)

    w1p = (jnp.zeros((input_dim, H_PAD), jnp.float32)
           .at[:, :hidden_dim].set(w1).astype(jnp.bfloat16))
    b1p = jnp.zeros((1, H_PAD), jnp.float32).at[0, :hidden_dim].set(b1)
    w2p = (jnp.zeros((H_PAD, A_PAD), jnp.float32)
           .at[:hidden_dim, :num_actions].set(w2).astype(jnp.bfloat16))
    b2p = jnp.zeros((1, A_PAD), jnp.float32).at[0, :num_actions].set(b2)
    return w1p, b1p, w2p, b2p


def _reference(x, w1p, b1p, w2p, b2p, num_actions, bf16_math):
    """Pure-JAX reference with the same stored weights."""
    if bf16_math:
        h = jnp.dot(x.astype(jnp.bfloat16), w1p, preferred_element_type=jnp.float32) + b1p
        h = jnp.maximum(h, 0.0)
        q = jnp.dot(h.astype(jnp.bfloat16), w2p, preferred_element_type=jnp.float32) + b2p
        q = q.astype(jnp.bfloat16).astype(jnp.float32)   # kernel rounds q to bf16 on store
    else:
        h = jnp.maximum(x @ w1p.astype(jnp.float32) + b1p, 0.0)
        q = h @ w2p.astype(jnp.float32) + b2p
    return q[:, :num_actions]


if __name__ == "__main__":
    input_dim, hidden_dim, num_actions = 27, 64, 6

    key = jax.random.PRNGKey(0)
    k_x, k_p, k_mid, k_big = jax.random.split(key, 4)
    params = init_qnet_params(k_p, input_dim, hidden_dim, num_actions)

    # Small case matching the module's natural usage (batch=2 states).
    x = jax.random.normal(k_x, (2, input_dim), jnp.float32)
    q, act = qnet_forward(x, *params, num_actions=num_actions)
    jax.block_until_ready((q, act))
    assert q.shape == (2, num_actions) and act.shape == (2,)
    ref_bf16 = _reference(x, *params, num_actions=num_actions, bf16_math=True)
    ref_f32 = _reference(x, *params, num_actions=num_actions, bf16_math=False)
    assert jnp.allclose(q, ref_bf16, atol=1e-2, rtol=1e-2)    # same-math (bf16-rounded) match
    assert jnp.allclose(q, ref_f32, atol=5e-2, rtol=5e-2)     # bf16 vs f32 drift
    assert jnp.array_equal(act, jnp.argmax(q, axis=1))        # fused greedy argmax

    # Ragged batch exercises batch padding + the 2-step (megacore-friendly) grid.
    xm = jax.random.normal(k_mid, (100, input_dim), jnp.float32)
    qm, actm = qnet_forward(xm, *params, num_actions=num_actions)
    jax.block_until_ready((qm, actm))
    refm = _reference(xm, *params, num_actions=num_actions, bf16_math=True)
    assert qm.shape == (100, num_actions) and actm.shape == (100,)
    assert jnp.allclose(qm, refm, atol=1e-2, rtol=1e-2)
    assert jnp.array_equal(actm, jnp.argmax(qm, axis=1))

    # Replay-buffer-sized batch: multiple pipelined 1024-row grid steps.
    xb = jax.random.normal(k_big, (2048, input_dim), jnp.float32)
    qb, actb = qnet_forward(xb, *params, num_actions=num_actions)
    jax.block_until_ready((qb, actb))
    refb = _reference(xb, *params, num_actions=num_actions, bf16_math=True)
    assert qb.shape == (2048, num_actions) and actb.shape == (2048,)
    assert jnp.allclose(qb, refb, atol=1e-2, rtol=1e-2)
    assert jnp.array_equal(actb, jnp.argmax(qb, axis=1))

    print("KERNEL_OK")
</pallas_src>

<mosaic_0001>
module attributes {stable_mosaic.version = 11 : i64} {
  func.func @qnet_kernel(%arg0: i32, %arg1: memref<8x27xf32, #tpu.memory_space<vmem>>, %arg2: memref<27x128xbf16, #tpu.memory_space<vmem>>, %arg3: memref<1x128xf32, #tpu.memory_space<vmem>>, %arg4: memref<128x128xbf16, #tpu.memory_space<vmem>>, %arg5: memref<1x128xf32, #tpu.memory_space<vmem>>, %arg6: memref<8x8xbf16, #tpu.memory_space<vmem>>, %arg7: memref<8x1xi32, #tpu.memory_space<vmem>>) attributes {dimension_semantics = [#tpu.dimension_semantics<parallel>], iteration_bounds = array<i64: 1>, scalar_prefetch = 0 : i64, scratch_operands = 0 : i64, tpu.core_type = #tpu.core_type<tc>, window_params = [{transform_indices = @transform_0, window_bounds = array<i64: 8, 27>}, {pipeline_mode = #tpu.pipeline_mode<synchronous>, transform_indices = @transform_1, window_bounds = array<i64: 27, 128>}, {pipeline_mode = #tpu.pipeline_mode<synchronous>, transform_indices = @transform_2, window_bounds = array<i64: 1, 128>}, {pipeline_mode = #tpu.pipeline_mode<synchronous>, transform_indices = @transform_3, window_bounds = array<i64: 128, 128>}, {pipeline_mode = #tpu.pipeline_mode<synchronous>, transform_indices = @transform_4, window_bounds = array<i64: 1, 128>}, {transform_indices = @transform_5, window_bounds = array<i64: 8, 8>}, {transform_indices = @transform_6, window_bounds = array<i64: 8, 1>}]} {
    %c0 = arith.constant 0 : index
    %c0_0 = arith.constant 0 : index
    %0 = vector.load %arg1[%c0, %c0_0] : memref<8x27xf32, #tpu.memory_space<vmem>>, vector<8x27xf32>
    %1 = arith.truncf %0 : vector<8x27xf32> to vector<8x27xbf16>
    %c0_1 = arith.constant 0 : index
    %c0_2 = arith.constant 0 : index
    %2 = vector.load %arg2[%c0_1, %c0_2] : memref<27x128xbf16, #tpu.memory_space<vmem>>, vector<27x128xbf16>
    %cst = arith.constant dense<0.000000e+00> : vector<8x128xf32>
    %3 = tpu.matmul %1, %2, %cst {dimension_numbers = #tpu.dot_dimension_numbers<[1], [0], [0], [1], [0, 0, 1, 1], [], []>} : vector<8x27xbf16>, vector<27x128xbf16>, vector<8x128xf32> -> vector<8x128xf32>
    %c0_3 = arith.constant 0 : index
    %c0_4 = arith.constant 0 : index
    %4 = vector.load %arg3[%c0_3, %c0_4] : memref<1x128xf32, #tpu.memory_space<vmem>>, vector<1x128xf32>
    %5 = vector.broadcast %4 : vector<1x128xf32> to vector<8x128xf32>
    %6 = arith.addf %3, %5 : vector<8x128xf32>
    %cst_5 = arith.constant 0.000000e+00 : f32
    %7 = vector.broadcast %cst_5 : f32 to vector<8x128xf32>
    %8 = arith.maximumf %6, %7 : vector<8x128xf32>
    %9 = arith.truncf %8 : vector<8x128xf32> to vector<8x128xbf16>
    %c0_6 = arith.constant 0 : index
    %c0_7 = arith.constant 0 : index
    %10 = vector.load %arg4[%c0_6, %c0_7] : memref<128x128xbf16, #tpu.memory_space<vmem>>, vector<128x128xbf16>
    %cst_8 = arith.constant dense<0.000000e+00> : vector<8x128xf32>
    %11 = tpu.matmul %9, %10, %cst_8 {dimension_numbers = #tpu.dot_dimension_numbers<[1], [0], [0], [1], [0, 0, 1, 1], [], []>} : vector<8x128xbf16>, vector<128x128xbf16>, vector<8x128xf32> -> vector<8x128xf32>
    %c0_9 = arith.constant 0 : index
    %c0_10 = arith.constant 0 : index
    %12 = vector.load %arg5[%c0_9, %c0_10] : memref<1x128xf32, #tpu.memory_space<vmem>>, vector<1x128xf32>
    %13 = vector.broadcast %12 : vector<1x128xf32> to vector<8x128xf32>
    %14 = arith.addf %11, %13 : vector<8x128xf32>
    %15 = arith.truncf %14 : vector<8x128xf32> to vector<8x128xbf16>
    %16 = vector.extract_strided_slice %15 {offsets = [0, 0], sizes = [8, 8], strides = [1, 1]} : vector<8x128xbf16> to vector<8x8xbf16>
    %c0_11 = arith.constant 0 : index
    %c0_12 = arith.constant 0 : index
    %17 = vector.load %arg6[%c0_11, %c0_12] : memref<8x8xbf16, #tpu.memory_space<vmem>>, vector<8x8xbf16>
    tpu.vector_store %arg6[%c0_11, %c0_12], %16 {strides = array<i32>} : memref<8x8xbf16, #tpu.memory_space<vmem>>, vector<8x8xbf16>,
    %18 = arith.extf %15 : vector<8x128xbf16> to vector<8x128xf32>
    %19 = tpu.iota {dimensions = array<i32: 1>} : vector<8x128xi32>
    %c6_i32 = arith.constant 6 : i32
    %20 = vector.broadcast %c6_i32 : i32 to vector<8x128xi32>
    %21 = arith.cmpi slt, %19, %20 : vector<8x128xi32>
    %cst_13 = arith.constant 0xFF800000 : f32
    %22 = vector.broadcast %cst_13 : f32 to vector<8x128xf32>
    %23 = arith.select %21, %18, %22 : vector<8x128xi1>, vector<8x128xf32>
    %cst_14 = arith.constant dense<0xFF800000> : vector<8xf32>
    %24 = vector.multi_reduction <maximumf>, %23, %cst_14 [1] : vector<8x128xf32> to vector<8xf32>
    %25 = vector.shape_cast %24 : vector<8xf32> to vector<8x1xf32>
    %26 = vector.broadcast %25 : vector<8x1xf32> to vector<8x128xf32>
    %27 = arith.cmpf oeq, %23, %26 : vector<8x128xf32>
    %c128_i32 = arith.constant 128 : i32
    %28 = vector.broadcast %c128_i32 : i32 to vector<8x128xi32>
    %29 = arith.select %27, %19, %28 : vector<8x128xi1>, vector<8x128xi32>
    %cst_15 = arith.constant dense<2147483647> : vector<8xi32>
    %30 = vector.multi_reduction <minsi>, %29, %cst_15 [1] : vector<8x128xi32> to vector<8xi32>
    %31 = vector.shape_cast %30 : vector<8xi32> to vector<8x1xi32>
    %c0_16 = arith.constant 0 : index
    %c0_17 = arith.constant 0 : index
    %32 = vector.load %arg7[%c0_16, %c0_17] : memref<8x1xi32, #tpu.memory_space<vmem>>, vector<8x1xi32>
    tpu.vector_store %arg7[%c0_16, %c0_17], %31 {strides = array<i32>} : memref<8x1xi32, #tpu.memory_space<vmem>>, vector<8x1xi32>,
    return
  }
  func.func @transform_0(%arg0: i32) -> (i32, i32) {
    %c0_i32 = arith.constant 0 : i32
    %c0_i32_0 = arith.constant 0 : i32
    return %arg0, %c0_i32 : i32, i32
  }
  func.func @transform_1(%arg0: i32) -> (i32, i32) {
    %c0_i32 = arith.constant 0 : i32
    %c0_i32_0 = arith.constant 0 : i32
    %c0_i32_1 = arith.constant 0 : i32
    return %c0_i32, %c0_i32_0 : i32, i32
  }
  func.func @transform_2(%arg0: i32) -> (i32, i32) {
    %c0_i32 = arith.constant 0 : i32
    %c0_i32_0 = arith.constant 0 : i32
    %c0_i32_1 = arith.constant 0 : i32
    return %c0_i32, %c0_i32_0 : i32, i32
  }
  func.func @transform_3(%arg0: i32) -> (i32, i32) {
    %c0_i32 = arith.constant 0 : i32
    %c0_i32_0 = arith.constant 0 : i32
    %c0_i32_1 = arith.constant 0 : i32
    return %c0_i32, %c0_i32_0 : i32, i32
  }
  func.func @transform_4(%arg0: i32) -> (i32, i32) {
    %c0_i32 = arith.constant 0 : i32
    %c0_i32_0 = arith.constant 0 : i32
    %c0_i32_1 = arith.constant 0 : i32
    return %c0_i32, %c0_i32_0 : i32, i32
  }
  func.func @transform_5(%arg0: i32) -> (i32, i32) {
    %c0_i32 = arith.constant 0 : i32
    %c0_i32_0 = arith.constant 0 : i32
    return %arg0, %c0_i32 : i32, i32
  }
  func.func @transform_6(%arg0: i32) -> (i32, i32) {
    %c0_i32 = arith.constant 0 : i32
    %c0_i32_0 = arith.constant 0 : i32
    return %arg0, %c0_i32 : i32, i32
  }
}

</mosaic_0001>

<bundles_post_ra>
// kernel: tpu_custom_call.1
= control target key start
LH: loop header
LB: loop body
LE: loop exit
PB: predicated region body
PF: predicated region fallthrough
CT: control target
= control target key end

     0   :  { %12 = vsyncpa [#allocation3], 0  ;;  %s522_s0 = inlined_call_operand.hbm [shape: f32[8,27], index: 0, kind: input, shape index: {}]   ;;  %s523_s1 = inlined_call_operand.hbm [shape: bf16[27,128], index: 1, kind: input, shape index: {}]   ;;  %s524_s2 = inlined_call_operand.vmem [shape: f32[1,128], index: 2, kind: input, shape index: {}]   ;;  %s525_s3 = inlined_call_operand.hbm [shape: bf16[128,128], index: 3, kind: input, shape index: {}]   ;;  %s526_s4 = inlined_call_operand.vmem [shape: f32[1,128], index: 4, kind: input, shape index: {}]   ;;  %s527_s5 = inlined_call_operand.hbm [shape: bf16[8,8], index: 5, kind: output, shape index: {0}]   ;;  %s528_s6 = inlined_call_operand.vmem [shape: s32[8,1], index: 6, kind: output, shape index: {1}]  }
   0x1   :  { %13 = vsyncpa [#allocation6], 0 }
   0x2   :  { %14 = vsyncpa [#allocation4], 0  ;;  %s457_s21 = smov [#allocation5]  }
   0x3   :  { %s30_s22 = sshll.u32 %s457_s21, 4  ;;  %s31_s22 = int_to_ptr.vmem [resolvable:$true] %s30_s22 }
   0x4   :  { %s379_s23 = scalar_lea.vmem %s31_s22, 256  ;;  %p384_p1 = scmp.lt.s32.totalorder %s31_s22, %s31_s22 }
   0x5   :  { %p380_p0 = scmp.ne.s32.totalorder %s31_s22, %s379_s23  ;;  %p385_p2 = scmp.lt.s32.totalorder %s379_s23, %s379_s23 }
   0x7   :  { %p386_p3 = por %p385_p2, %p384_p1 }
   0x9   :  { %p387_p4 = pnand %p386_p3, %p380_p0 }
   0xb   :  { %390 = shalt.err (!%p387_p4)
}
   0xc   :  { %s458_s24 = smov 64   ;;  %s459_s25 = smov 4  }
   0xd   :  { %36 = dma.hbm_to_vmem [thread:$0]  %s523_s1, 256, %s31_s22, [#allocation6], %s458_s24, %s458_s24, %s459_s25  }
   0xe   :  { %s460_s28 = smov [#allocation2]   ;;  %s461_s30 = smov [#allocation7]  }
   0xf   :  { %s21_s29 = sshll.u32 %s460_s28, 4  ;;  %s44_s7 = sshll.u32 %s461_s30, 4  ;;  %s22_s29 = int_to_ptr.vmem [resolvable:$true] %s21_s29  ;;  %s45_s7 = int_to_ptr.vmem [resolvable:$true] %s44_s7 }
  0x10   :  { %s399_s8 = scalar_lea.vmem %s22_s29, 128  ;;  %p404_p6 = scmp.lt.s32.totalorder %s22_s29, %s22_s29 }
  0x11   :  { %p400_p5 = scmp.ne.s32.totalorder %s22_s29, %s399_s8  ;;  %p405_p7 = scmp.lt.s32.totalorder %s399_s8, %s399_s8 }
  0x13   :  { %p406_p8 = por %p405_p7, %p404_p6 }
  0x15   :  { %p407_p9 = pnand %p406_p8, %p400_p5 }
  0x17   :  { %410 = shalt.err (!%p407_p9)
}
  0x18   :  { %24 = dma.hbm_to_vmem [thread:$0]  %s522_s0, 128, %s22_s29, [#allocation3]  }
  0x19   :  { %s419_s11 = scalar_lea.vmem %s45_s7, 1024  ;;  %p424_p11 = scmp.lt.s32.totalorder %s45_s7, %s45_s7 }
  0x1a   :  { %p420_p10 = scmp.ne.s32.totalorder %s45_s7, %s419_s11  ;;  %p425_p12 = scmp.lt.s32.totalorder %s419_s11, %s419_s11 }
  0x1c   :  { %p426_p13 = por %p425_p12, %p424_p11 }
  0x1e   :  { %p427_p0 = pnand %p426_p13, %p420_p10 }
  0x20   :  { %430 = shalt.err (!%p427_p0)
}
  0x21   :  { %50 = dma.hbm_to_vmem [thread:$0]  %s525_s3, 1024, %s45_s7, [#allocation6], %s458_s24, %s458_s24, %s459_s25  }
  0x22   :  { %451 = dma.done.wait [#allocation3], 128  }
  0x23   :  { %452 = vsyncadd [#allocation3], 4294967168 }
  0x24   :  { %453 = dma.done.wait [#allocation6], 1280  }
  0x25   :  { %454 = vsyncadd [#allocation6], 4294966016  ;;  %vm91_vm0 = vcmask 1044480   ;;  %v462_v0 = vmov 0.0   ;;  %vm463_vm1 = vmmov 0   ;;  %vm92_vm2 = vcmask 1045504  }
  0x26   :  { %324 = vmatprep.subr.bf16.mxu0 %v462_v0  ;;  %332 = vmatprep.subr.bf16.mxu1 %v462_v0  ;;  %v464_v1 = vmov 65535   ;;  %v361_v4 = vld [vmem:[#allocation5 + $0x8] sm:$0x3f]   ;;  %v362_v6 = vld [vmem:[#allocation5] sm:$0xff]   ;;  %v63_v8 = vld [vmem:[#allocation2] sm:$0xff]  ;;  %vm87_vm3 = vcmask 220160   ;;  %v255_v25 = vlaneseq }
  0x27   :  { %328 = vmatprep.mubr.msk.bf16.mxu0 %vm463_vm1, %v462_v0  ;;  %348 = vmatprep.mubr.msk.bf16.mxu1 %vm463_vm1, %v462_v0  ;;  %v93_v2 = vsel %vm91_vm0, 4294967295, %v464_v1  ;;  %v363_v7 = vld [vmem:[#allocation7 + $0x38] sm:$0xff]   ;;  %v364_v9 = vld [vmem:[#allocation7 + $0x30] sm:$0xff]   ;;  %v64_v10 = vpack.c.bf16 %v63_v8, %v63_v8  ;;  %v365_v11 = vld [vmem:[#allocation7 + $0x28] sm:$0xff]   ;;  %vm252_vm4 = vcmask 60416  }
  0x28   :  { %v94_v3 = vsel %vm92_vm2, %v93_v2, 0  ;;  %333 = vmatpush3.bf16.msra.mxu1 %v363_v7  ;;  %v366_v12 = vld [vmem:[#allocation7 + $0x20] sm:$0xff]   ;;  %v367_v13 = vld [vmem:[#allocation7 + $0x18] sm:$0xff]   ;;  %v368_v14 = vld [vmem:[#allocation7 + $0x10] sm:$0xff]   ;;  %v256_v28 = vand.u32 127, %v255_v25 }
  0x29   :  { %v96_v5 = vand.u32 %v361_v4, %v94_v3  ;;  %334 = vmatprep.subr.bf16.mxu1 %v462_v0  ;;  %v369_v15 = vld [vmem:[#allocation7 + $0x8] sm:$0xff]   ;;  %v370_v16 = vld [vmem:[#allocation7] sm:$0xff]  }
  0x2a   :  { %v299_v17 = vld [vmem:[%s524_s2] ss:$0 sm:$0xff]  ;;  %vm257_vm5 = vcmp.lt.s32.totalorder %v256_v28, 6  ;;  %s465_s2 = smov [#allocation8]  }
  0x2b   :  { %325 = vmatpush3.bf16.msra.mxu0 %v96_v5  ;;  %v303_v26 = vld [vmem:[%s526_s4] ss:$0 sm:$0xff]  ;;  %s285_s4 = sshll.u32 %s465_s2, 4  ;;  %s286_s4 = int_to_ptr.vmem [resolvable:$true] %s285_s4 }
  0x2c   :  { %326 = vmatprep.subr.bf16.mxu0 %v462_v0  ;;  %335 = vmatpush3.bf16.msra.mxu1 %v364_v9  ;;  %s431_s15 = scalar_lea.vmem %s286_s4, 64  ;;  %p436_p2 = scmp.lt.s32.totalorder %s286_s4, %s286_s4 }
  0x2d   :  { %336 = vmatprep.subr.bf16.mxu1 %v462_v0  ;;  %p432_p1 = scmp.ne.s32.totalorder %s286_s4, %s431_s15  ;;  %p437_p3 = scmp.lt.s32.totalorder %s431_s15, %s431_s15 }
  0x2f   :  { %327 = vmatpush3.bf16.msra.mxu0 %v362_v6  ;;  %p438_p4 = por %p437_p3, %p436_p2 }
  0x30   :  { %337 = vmatpush3.bf16.msra.mxu1 %v365_v11 }
  0x31   :  { %338 = vmatprep.subr.bf16.mxu1 %v462_v0  ;;  %p439_p5 = pnand %p438_p4, %p432_p1 }
  0x32   :  { %329 = vmatmul.mubr.msk.bf16.vlgmr.msra.gmra.mxu0 %vm87_vm3, %v64_v10 }
  0x34   :  { %339 = vmatpush3.bf16.msra.mxu1 %v366_v12 }
  0x35   :  { %340 = vmatprep.subr.bf16.mxu1 %v462_v0 }
  0x38   :  { %341 = vmatpush3.bf16.msra.mxu1 %v367_v13 }
  0x39   :  { %342 = vmatprep.subr.bf16.mxu1 %v462_v0 }
  0x3c   :  { %343 = vmatpush3.bf16.msra.mxu1 %v368_v14 }
  0x3d   :  { %344 = vmatprep.subr.bf16.mxu1 %v462_v0 }
  0x40   :  { %345 = vmatpush3.bf16.msra.mxu1 %v369_v15 }
  0x41   :  { %346 = vmatprep.subr.bf16.mxu1 %v462_v0 }
  0x44   :  { %347 = vmatpush3.bf16.msra.mxu1 %v370_v16 }
  0xf2   :  { %v132_v18 = vpop.f32.mrf.mxu0 }
  0xf3   :  { %v133_v19 = vadd.f32 %v299_v17, %v132_v18 }
  0xf4   :  { %v330_v20 = vpop.f32.mrf.mxu0 }
  0xf5   :  { %v138_v21 = vmax.f32 %v133_v19, 0.0 }
  0xf6   :  { %v135_v22 = vpop.f32.mrf.mxu0 }
  0xf7   :  { %v139_v23 = vpack.c.bf16 %v138_v21, %v138_v21 }
  0xf8   :  { %v331_v24 = vpop.f32.mrf.mxu0 }
  0xf9   :  { %349 = vmatmul.mubr.bf16.vlgmr.msra.gmra.mxu1 %v139_v23 }
 0x1b9   :  { %v245_v27 = vpop.f32.mrf.mxu1 }
 0x1ba   :  { %v246_v29 = vadd.f32 %v303_v26, %v245_v27 }
 0x1bb   :  { %v350_v30 = vpop.f32.mrf.mxu1 }
 0x1bc   :  { %v251_v31 = vpack.c.bf16 %v246_v29, %v246_v29 }
 0x1bd   :  { %v248_v32 = vpop.f32.mrf.mxu1 }
 0x1be   :  { %v254_v33 = vunpack.c.l.bf16 %v251_v31  ;;  %253 = vst.msk [vmem:[#allocation8] sm:$0xf] %vm252_vm4, %v251_v31 }
 0x1bf   :  { %v351_v34 = vpop.f32.mrf.mxu1 }
 0x1c0   :  { %v258_v35 = vsel %vm257_vm5, %v254_v33, -inf }
 0x1c1   :  { %259 = vmax.xlane.f32.xlu0 %v258_v35 }
 0x24a   :  { %v260_v36 = vpop.xlane.xlu0 %259 }
 0x24b   :  { %vm261_vm6 = vcmp.eq.f32.partialorder %v258_v35, %v260_v36 }
 0x24c   :  { %v262_v37 = vsel %vm261_vm6, %v256_v28, 128 }
 0x24d   :  { %v264_v38 = vshra.s32 %v262_v37, 16  ;;  %v263_v40 = vand.u32 65535, %v262_v37 }
 0x24f   :  { %v266_v39 = vcvt.s32.f32 %v264_v38  ;;  %v265_v42 = vcvt.s32.f32 %v263_v40 }
 0x251   :  { %267 = vmin.xlane.f32.xlu0 %v266_v39 }
 0x2da   :  { %v268_v41 = vpop.xlane.xlu0 %267 }
 0x2db   :  { %vm269_vm7 = vcmp.eq.f32.partialorder %v266_v39, %v268_v41 }
 0x2dc   :  { %v270_v43 = vsel %vm269_vm7, %v265_v42, inf }
 0x2dd   :  { %271 = vmin.xlane.f32.xlu1 %v270_v43 }
 0x2de   :  { %442 = shalt.err (!%p439_p5)
}
 0x2df   :  { %288 = dma.vmem_to_hbm [thread:$0]  %s286_s4, 64, %s527_s5, [#allocation4]   ;;  %v274_v44 = vcvt.f32.s32 %v268_v41  ;;  %vm277_vm8 = vcmask 7168  }
 0x2e1   :  { %v275_v46 = vshll.u32 %v274_v44, 16 }
 0x366   :  { %v272_v45 = vpop.xlane.xlu1 %271 }
 0x367   :  { %v273_v47 = vcvt.f32.s32 %v272_v45 }
 0x369   :  { %v276_v48 = vadd.s32 %v275_v46, %v273_v47 }
 0x36b   :  { %278 = vst.msk [vmem:[%s528_s6] sm:$0xff] %vm277_vm8, %v276_v48 }
 0x36c   :  { %455 = dma.done.wait [#allocation4], 64  }
 0x36d   :  { %456 = vsyncadd [#allocation4], 4294967232 }
 0x36e   :  { %296 = vsyncpa [#allocation3], 1 }
 0x36f   :  { %297 = vsyncpa [#allocation6], 1 }
 0x370   :  { %298 = vsyncpa [#allocation4], 1 }

</bundles_post_ra>
